<compile_context>
chip_gen: v7x
topology: tpu7x:2x2x1
jax: 0.10.0
libtpu: 0.0.40
codegen_flags: <defaults>
</compile_context>

<pallas_src>
import jax
import jax.numpy as jnp
from jax.experimental import pallas as pl
from jax.experimental.pallas import tpu as pltpu


def conv1x1_relu_kernel(x_ref, w_ref, b_ref, o_ref):
    # x_ref: (1, Cin, TS)  spatial tile of one sample, spatial on lanes
    # w_ref: (Cout, Cin)   full weight
    # b_ref: (Cout, 1)     full bias
    # o_ref: (1, Cout, TS) lane-dense output tile
    _, cout, ts = o_ref.shape
    cin = x_ref.shape[1]

    x = x_ref[0]          # (Cin, TS)
    w = w_ref[...]        # (Cout, Cin)

    acc = jnp.zeros((cout, ts), jnp.float32)
    for c in range(cin):  # Cin = 3: fully unrolled VPU broadcast-FMAs, no MXU
        acc = acc + w[:, c:c + 1] * x[c:c + 1, :]   # (Cout,1)*(1,TS) -> (Cout,TS)

    y = acc + b_ref[...]                             # bias broadcast over lanes
    o_ref[0] = jnp.maximum(y, 0.0).astype(o_ref.dtype)


def _pick_spatial_tile(S, max_tile=2048):
    """Largest multiple of 128 that divides S (<= max_tile); else full S."""
    if S % 128 != 0:
        return S  # full-extent block is always legal
    ts = 128
    for cand in range(256, min(S, max_tile) + 1, 128):
        if S % cand == 0:
            ts = cand
    return ts


def conv1x1_relu(x_nchw, weight, bias, *, max_tile=2048):
    """x_nchw: (N, Cin, H, W); weight: (Cout, Cin); bias: (Cout,)"""
    N, Cin, H, W = x_nchw.shape
    Cout = weight.shape[0]
    S = H * W

    x = x_nchw.reshape(N, Cin, S)                     # free (contiguous) reshape
    w = weight.astype(jnp.float32)                    # (Cout, Cin)
    b = bias.reshape(Cout, 1).astype(jnp.float32)     # (Cout, 1)

    ts = _pick_spatial_tile(S, max_tile)
    grid = (N, S // ts)

    cost = pl.CostEstimate(
        flops=2 * N * S * Cin * Cout,
        transcendentals=0,
        bytes_accessed=4 * (N * Cin * S + N * Cout * S + Cout * Cin + Cout),
    )

    out = pl.pallas_call(
        conv1x1_relu_kernel,
        out_shape=jax.ShapeDtypeStruct((N, Cout, S), jnp.float32),
        grid_spec=pltpu.PrefetchScalarGridSpec(
            num_scalar_prefetch=0,
            grid=grid,
            in_specs=[
                pl.BlockSpec((1, Cin, ts), lambda n, s: (n, 0, s)),   # X tile
                pl.BlockSpec((Cout, Cin), lambda n, s: (0, 0)),       # full W
                pl.BlockSpec((Cout, 1), lambda n, s: (0, 0)),         # full bias
            ],
            out_specs=pl.BlockSpec((1, Cout, ts), lambda n, s: (n, 0, s)),
        ),
        compiler_params=pltpu.CompilerParams(
            dimension_semantics=("parallel", "parallel")),
        cost_estimate=cost,
    )(x, w, b)

    return out.reshape(N, Cout, H, W)                 # free reshape back


def reference(x_nchw, weight, bias):
    # Pure-JAX reference: 1x1 conv == channel matmul.
    y = jnp.einsum("nchw,oc->nohw", x_nchw, weight) + bias[None, :, None, None]
    return jnp.maximum(y, 0.0)


if __name__ == "__main__":
    key = jax.random.PRNGKey(0)
    k_x, k_w, k_b = jax.random.split(key, 3)

    # Small shapes consistent with the module (Conv2d(3, 32, 1)).
    N, Cin, H, W = 2, 3, 16, 16
    Cout = 32

    x = jax.random.normal(k_x, (N, Cin, H, W), dtype=jnp.float32)
    # Deterministic param init (mimics PyTorch's uniform(-1/sqrt(fan_in), ...)).
    bound = 1.0 / jnp.sqrt(jnp.float32(Cin))
    weight = jax.random.uniform(k_w, (Cout, Cin), jnp.float32, -bound, bound)
    bias = jax.random.uniform(k_b, (Cout,), jnp.float32, -bound, bound)

    out = conv1x1_relu(x, weight, bias)
    out = jax.block_until_ready(out)

    ref = reference(x, weight, bias)
    assert out.shape == (N, Cout, H, W)
    assert jnp.allclose(out, ref, atol=1e-5, rtol=1e-5)

    print("KERNEL_OK")
</pallas_src>

<mosaic_0001>
module attributes {stable_mosaic.version = 11 : i64} {
  func.func @conv1x1_relu_kernel(%arg0: i32, %arg1: i32, %arg2: memref<1x3x256xf32, #tpu.memory_space<vmem>>, %arg3: memref<32x3xf32, #tpu.memory_space<vmem>>, %arg4: memref<32x1xf32, #tpu.memory_space<vmem>>, %arg5: memref<1x32x256xf32, #tpu.memory_space<vmem>>) attributes {dimension_semantics = [#tpu.dimension_semantics<parallel>, #tpu.dimension_semantics<parallel>], iteration_bounds = array<i64: 2, 1>, scalar_prefetch = 0 : i64, scratch_operands = 0 : i64, tpu.core_type = #tpu.core_type<tc>, window_params = [{transform_indices = @transform_0, window_bounds = array<i64: 1, 3, 256>}, {pipeline_mode = #tpu.pipeline_mode<synchronous>, transform_indices = @transform_1, window_bounds = array<i64: 32, 3>}, {pipeline_mode = #tpu.pipeline_mode<synchronous>, transform_indices = @transform_2, window_bounds = array<i64: 32, 1>}, {transform_indices = @transform_3, window_bounds = array<i64: 1, 32, 256>}]} {
    %c0 = arith.constant 0 : index
    %c0_0 = arith.constant 0 : index
    %c0_1 = arith.constant 0 : index
    %0 = vector.load %arg2[%c0, %c0_0, %c0_1] : memref<1x3x256xf32, #tpu.memory_space<vmem>>, vector<1x3x256xf32>
    %1 = vector.shape_cast %0 : vector<1x3x256xf32> to vector<3x256xf32>
    %c0_2 = arith.constant 0 : index
    %c0_3 = arith.constant 0 : index
    %2 = vector.load %arg3[%c0_2, %c0_3] : memref<32x3xf32, #tpu.memory_space<vmem>>, vector<32x3xf32>
    %cst = arith.constant 0.000000e+00 : f32
    %3 = vector.broadcast %cst : f32 to vector<32x256xf32>
    %4 = vector.extract_strided_slice %2 {offsets = [0, 0], sizes = [32, 1], strides = [1, 1]} : vector<32x3xf32> to vector<32x1xf32>
    %5 = vector.extract_strided_slice %1 {offsets = [0, 0], sizes = [1, 256], strides = [1, 1]} : vector<3x256xf32> to vector<1x256xf32>
    %6 = vector.broadcast %4 : vector<32x1xf32> to vector<32x256xf32>
    %7 = vector.broadcast %5 : vector<1x256xf32> to vector<32x256xf32>
    %8 = arith.mulf %6, %7 : vector<32x256xf32>
    %9 = arith.addf %3, %8 : vector<32x256xf32>
    %10 = vector.extract_strided_slice %2 {offsets = [0, 1], sizes = [32, 1], strides = [1, 1]} : vector<32x3xf32> to vector<32x1xf32>
    %11 = vector.extract_strided_slice %1 {offsets = [1, 0], sizes = [1, 256], strides = [1, 1]} : vector<3x256xf32> to vector<1x256xf32>
    %12 = vector.broadcast %10 : vector<32x1xf32> to vector<32x256xf32>
    %13 = vector.broadcast %11 : vector<1x256xf32> to vector<32x256xf32>
    %14 = arith.mulf %12, %13 : vector<32x256xf32>
    %15 = arith.addf %9, %14 : vector<32x256xf32>
    %16 = vector.extract_strided_slice %2 {offsets = [0, 2], sizes = [32, 1], strides = [1, 1]} : vector<32x3xf32> to vector<32x1xf32>
    %17 = vector.extract_strided_slice %1 {offsets = [2, 0], sizes = [1, 256], strides = [1, 1]} : vector<3x256xf32> to vector<1x256xf32>
    %18 = vector.broadcast %16 : vector<32x1xf32> to vector<32x256xf32>
    %19 = vector.broadcast %17 : vector<1x256xf32> to vector<32x256xf32>
    %20 = arith.mulf %18, %19 : vector<32x256xf32>
    %21 = arith.addf %15, %20 : vector<32x256xf32>
    %c0_4 = arith.constant 0 : index
    %c0_5 = arith.constant 0 : index
    %22 = vector.load %arg4[%c0_4, %c0_5] : memref<32x1xf32, #tpu.memory_space<vmem>>, vector<32x1xf32>
    %23 = vector.broadcast %22 : vector<32x1xf32> to vector<32x256xf32>
    %24 = arith.addf %21, %23 : vector<32x256xf32>
    %cst_6 = arith.constant 0.000000e+00 : f32
    %25 = vector.broadcast %cst_6 : f32 to vector<32x256xf32>
    %26 = arith.maximumf %24, %25 : vector<32x256xf32>
    %c0_7 = arith.constant 0 : index
    %c0_8 = arith.constant 0 : index
    %c0_9 = arith.constant 0 : index
    %27 = vector.load %arg5[%c0_7, %c0_8, %c0_9] : memref<1x32x256xf32, #tpu.memory_space<vmem>>, vector<1x32x256xf32>
    %28 = vector.shape_cast %27 : vector<1x32x256xf32> to vector<32x256xf32>
    %29 = vector.shape_cast %26 : vector<32x256xf32> to vector<1x32x256xf32>
    tpu.vector_store %arg5[%c0_7, %c0_8, %c0_9], %29 {strides = array<i32>} : memref<1x32x256xf32, #tpu.memory_space<vmem>>, vector<1x32x256xf32>,
    return
  }
  func.func @transform_0(%arg0: i32, %arg1: i32) -> (i32, i32, i32) {
    %c0_i32 = arith.constant 0 : i32
    %c0_i32_0 = arith.constant 0 : i32
    return %arg0, %c0_i32, %arg1 : i32, i32, i32
  }
  func.func @transform_1(%arg0: i32, %arg1: i32) -> (i32, i32) {
    %c0_i32 = arith.constant 0 : i32
    %c0_i32_0 = arith.constant 0 : i32
    %c0_i32_1 = arith.constant 0 : i32
    return %c0_i32, %c0_i32_0 : i32, i32
  }
  func.func @transform_2(%arg0: i32, %arg1: i32) -> (i32, i32) {
    %c0_i32 = arith.constant 0 : i32
    %c0_i32_0 = arith.constant 0 : i32
    %c0_i32_1 = arith.constant 0 : i32
    return %c0_i32, %c0_i32_0 : i32, i32
  }
  func.func @transform_3(%arg0: i32, %arg1: i32) -> (i32, i32, i32) {
    %c0_i32 = arith.constant 0 : i32
    %c0_i32_0 = arith.constant 0 : i32
    return %arg0, %c0_i32, %arg1 : i32, i32, i32
  }
}

</mosaic_0001>

<bundles_post_ra>
// kernel: tpu_custom_call.1
= control target key start
LH: loop header
LB: loop body
LE: loop exit
PB: predicated region body
PF: predicated region fallthrough
CT: control target
= control target key end

     0   :  { %8 = vsyncpa [#allocation3], 0  ;;  %s849_s0 = inlined_call_operand.vmem [shape: f32[2,3,256], index: 0, kind: input, shape index: {}]   ;;  %s850_s1 = inlined_call_operand.vmem [shape: f32[32,3], index: 1, kind: input, shape index: {}]   ;;  %s851_s2 = inlined_call_operand.vmem [shape: f32[32,1], index: 2, kind: input, shape index: {}]   ;;  %s852_s3 = inlined_call_operand.hbm [shape: f32[2,32,256], index: 3, kind: output, shape index: {}]  }
   0x1   :  { %10 = vsyncpa [#allocation3 + $0x1], 0  ;;  %s691_s12 = smov 0   ;;  %s693_s13 = smov 0  }
   0x2   :  { %s695_s14 = smov 0   ;;  %s697_s15 = smov 0  }
   0x3   :  { %s699_s16 = smov 0   ;;  %s701_s17 = smov 0  }
   0x4 LB: > { %s503_s18 = sadd.s32 4294967295, %s663_s17   ;;  %s504_s19 = sadd.s32 4294967294, %s663_s17   ;;  %s663_s17 = sphi %s701_s17, %s16_s17   ;;  %s659_s16 = sphi %s699_s16, %s859_s16   ;;  %s655_s15 = sphi %s697_s15, %s858_s15   ;;  %s651_s14 = sphi %s695_s14, %s857_s14   ;;  %s647_s13 = sphi %s693_s13, %s856_s13   ;;  %s643_s12 = sphi %s691_s12, %s855_s12  }
   0x5   : > { %s28_s20 = sadd.s32 1, %s659_s16  ;;  %s107_s21 = sadd.s32 1, %s651_s14 }
   0x6   : > { %p30_p0 = scmp.ge.s32.totalorder %s28_s20, 2  ;;  %p117_p1 = scmp.ne.s32.totalorder %s651_s14, %s647_s13 }
   0x7   : > { %p118_p2 = scmp.eq.s32.totalorder %s503_s18, 1  ;;  %p123_p3 = scmp.ne.s32.totalorder %s647_s13, %s643_s12 }
   0x8   : > { %s861_s20 = smov (%p30_p0, %s28_s20), 0  ;;  %p124_p5 = scmp.eq.s32.totalorder %s504_s19, 1 }
   0x9   : > { %p731_p4 = por %p118_p2, %p117_p1  ;;  %s102_s23 = ssub.s32 %s659_s16, %s861_s20 }
   0xa   : > { %p507_p6 = scmp.ge.s32.totalorder %s663_s17, 1  ;;  %p105_p7 = scmp.eq.s32.totalorder %s102_s23, 0 }
   0xb   : > { %p738_p8 = por %p124_p5, %p123_p3  ;;  %p161_p9 = scmp.lt.s32.totalorder %s663_s17, 3 }
   0xc   : > { %s744_s25 = scalar_select %p105_p7, %s651_s14, %s107_s21  }
   0xd   : > { %p162_p10 = pnand %p507_p6, %p161_p9 }
   0xe   : > { %v203_v0 = vld [vmem:[%s850_s1 + $0x10] sm:$0xff] (!%p162_p10)  ;;  %v201_v1 = vld [vmem:[%s850_s1] sm:$0xff] (!%p162_p10)  ;;  %v665_v2 = vmov (!%p162_p10), 1   ;;  %v666_v3 = vmov (!%p162_p10), 0   ;;  %v204_v4 = vld [vmem:[%s850_s1 + $0x18] sm:$0xff] (!%p162_p10)  ;;  %v667_v6 = vmov (!%p162_p10), 2   ;;  %v226_v11 = vlaneseq (!%p162_p10) }
   0xf   : > { %165 = sbr.rel (%p162_p10) target bundleno = 198 (0xc6), region = 32  ;;  %579 = vset.pattern.permute.xlu0 (!%p162_p10), %v665_v2  ;;  %578 = vset.pattern.permute.xlu1 (!%p162_p10), %v666_v3  ;;  %v202_v5 = vld [vmem:[%s850_s1 + $0x8] sm:$0xff] (!%p162_p10)  ;;  %v360_v7 = vld [vmem:[%s851_s2] sm:$0xff] (!%p162_p10)  ;;  %v363_v8 = vld [vmem:[%s851_s2 + $0x18] sm:$0xff] (!%p162_p10)  ;;  %p190_p11 = scmp.lt.s32.totalorder (!%p162_p10), %s655_s15, 1 }
  0x10   : > { %217 = vperm.xlu1 (!%p162_p10), %578, %v203_v0   ;;  %261 = vperm.xlu0 (!%p162_p10), %579, %v201_v1   ;;  %v361_v9 = vld [vmem:[%s851_s2 + $0x8] sm:$0xff] (!%p162_p10)  ;;  %v362_v10 = vld [vmem:[%s851_s2 + $0x10] sm:$0xff] (!%p162_p10)  ;;  %v227_v14 = vshrl.u32 (!%p162_p10), %v226_v11, 7  ;;  %s186_s30 = sand.u32 (!%p162_p10), 1, %s647_s13   ;;  %s517_s6 = sshll.u32 (!%p162_p10), %s655_s15, 10 }
  0x11   : > { %s508_s4 = sshll.u32 (!%p162_p10), %s186_s30, 6  ;;  %s795_s10 = scalar_lea.hbm (!%p162_p10), %s852_s3, %s517_s6 }
  0x12   : > { %v228_v16 = vsub.s32 (!%p162_p10), 0, %v227_v14  ;;  %v232_v17 = vsub.s32 (!%p162_p10), 4, %v227_v14  ;;  %v278_v20 = vsub.s32 (!%p162_p10), 1, %v227_v14  ;;  %v282_v21 = vsub.s32 (!%p162_p10), 5, %v227_v14  ;;  %s780_s5 = scalar_lea.vmem (!%p162_p10), [#allocation2], %s508_s4  ;;  %s668_s18 = smov (!%p162_p10), [#allocation2]  }
  0x13   : > { %v328_v22 = vsub.s32 (!%p162_p10), 2, %v227_v14  ;;  %v332_v23 = vsub.s32 (!%p162_p10), 6, %v227_v14  ;;  %s424_s7 = sshll.u32 (!%p162_p10), %s780_s5, 4  ;;  %s589_s19 = sshll.u32 (!%p162_p10), %s668_s18, 4  ;;  %s797_s7 = int_to_ptr.vmem [resolvable:$true] %s424_s7  ;;  %s590_s19 = int_to_ptr.vmem [resolvable:$false] %s589_s19 }
  0x14   : > { %222 = vperm.xlu1 (!%p162_p10), %578, %v204_v4   ;;  %273 = vperm.xlu0 (!%p162_p10), %579, %v204_v4   ;;  %s585_s11 = scalar_lea.vmem (!%p162_p10), %s797_s7, 1024  ;;  %s591_s21 = scalar_lea.vmem (!%p162_p10), %s590_s19, 2048 }
  0x15   : > { %p586_p12 = scmp.ne.s32.totalorder (!%p162_p10), %s797_s7, %s585_s11  ;;  %p592_p1 = scmp.lt.s32.totalorder (!%p162_p10), %s797_s7, %s590_s19 }
  0x16   : > { %s191_s23 = scalar_select %p190_p11, %s655_s15, 1 }
  0x17   : > { %s803_s15 = scalar_lea.sflag [#allocation3], %s186_s30  ;;  %p587_p13 = pnand %p586_p12, %p731_p4 }
  0x18   : > { %580 = vset.pattern.permute.xlu1 %v665_v2  ;;  %582 = vset.pattern.permute.xlu0 %v667_v6  ;;  %s516_s26 = sshll.u32 %s191_s23, 3  ;;  %p593_p2 = scmp.lt.s32.totalorder %s591_s21, %s585_s11 }
  0x19   : > { %265 = vperm.xlu1 %580, %v202_v5   ;;  %315 = vperm.xlu0 %582, %v202_v5   ;;  %s197_s29 = scalar_lea.vmem %s849_s0, %s516_s26  ;;  %p588_p0 = pneg %p587_p13 }
  0x1a   : > { %v200_v19 = vld [vmem:[%s197_s29] sm:$0x77]  ;;  %p594_p3 = por %p593_p2, %p592_p1 }
  0x1b   : > { %v229_v24 = vrot.slane %v200_v19, %v228_v16  ;;  %v233_v25 = vrot.slane %v200_v19, %v232_v17  ;;  %v279_v28 = vrot.slane %v200_v19, %v278_v20  ;;  %v283_v29 = vrot.slane %v200_v19, %v282_v21 }
  0x1c   : > { %v329_v30 = vrot.slane %v200_v19, %v328_v22  ;;  %v333_v31 = vrot.slane %v200_v19, %v332_v23  ;;  %p595_p5 = pnand %p594_p3, %p588_p0 }
  0x1d   : > { %269 = vperm.xlu1 %580, %v203_v0   ;;  %583 = vset.pattern.permute.xlu0 %v666_v3  ;;  %v239_v32 = vrot.slane %v229_v24, %v228_v16  ;;  %v243_v33 = vrot.slane %v233_v25, %v228_v16  ;;  %v289_v35 = vrot.slane %v279_v28, %v278_v20 }
  0x1e   : > { %207 = vperm.xlu0 %583, %v201_v1   ;;  %v293_v36 = vrot.slane %v283_v29, %v278_v20  ;;  %v339_v38 = vrot.slane %v329_v30, %v328_v22  ;;  %v343_v39 = vrot.slane %v333_v31, %v328_v22 }
  0x21   : > { %581 = vset.pattern.permute.xlu1 %v667_v6 }
  0x22   : > { %311 = vperm.xlu1 %581, %v201_v1   ;;  %212 = vperm.xlu0 %583, %v202_v5  }
  0x26   : > { %319 = vperm.xlu1 %581, %v203_v0   ;;  %366 = vperm.xlu0 %583, %v360_v7  }
  0x2a   : > { %323 = vperm.xlu1 %581, %v204_v4   ;;  %381 = vperm.xlu0 %583, %v363_v8  }
  0x2e   : > { %584 = vset.pattern.permute.xlu1 %v666_v3 }
  0x2f   : > { %371 = vperm.xlu1 %584, %v361_v9  }
  0x33   : > { %376 = vperm.xlu1 %584, %v362_v10  }
  0x8f   : > { %v772_v12 = vpop.permute.xlu1 %217  ;;  %v262_v13 = vpop.permute.xlu0 %261 }
  0x90   : > { %v294_v42 = vmul.f32 %v289_v35, %v262_v13  ;;  %v295_v43 = vmul.f32 %v293_v36, %v262_v13  ;;  %v248_v14 = vmul.f32 %v239_v32, %v772_v12 }
  0x93   : > { %v223_v15 = vpop.permute.xlu1 %222  ;;  %v274_v18 = vpop.permute.xlu0 %273 }
  0x94   : > { %v250_v52 = vmul.f32 %v239_v32, %v223_v15  ;;  %v251_v53 = vmul.f32 %v243_v33, %v223_v15  ;;  %v300_v58 = vmul.f32 %v289_v35, %v274_v18  ;;  %v301_v59 = vmul.f32 %v293_v36, %v274_v18 }
  0x95   : > { %v249_v15 = vmul.f32 %v243_v33, %v772_v12 }
  0x96   : > { %v308_v5 = vadd.f32 %v300_v58, %v250_v52  ;;  %v309_v6 = vadd.f32 %v301_v59, %v251_v53 }
  0x98   : > { %v266_v26 = vpop.permute.xlu1 %265  ;;  %v316_v27 = vpop.permute.xlu0 %315 }
  0x99   : > { %v296_v62 = vmul.f32 %v289_v35, %v266_v26  ;;  %v297_v63 = vmul.f32 %v293_v36, %v266_v26  ;;  %v346_v9 = vmul.f32 %v339_v38, %v316_v27  ;;  %v347_v10 = vmul.f32 %v343_v39, %v316_v27 }
  0x9c   : > { %v270_v34 = vpop.permute.xlu1 %269 }
  0x9d   : > { %v208_v37 = vpop.permute.xlu0 %207  ;;  %v298_v11 = vmul.f32 %v289_v35, %v270_v34  ;;  %v299_v13 = vmul.f32 %v293_v36, %v270_v34 }
  0x9e   : > { %v244_v40 = vmul.f32 %v239_v32, %v208_v37  ;;  %v245_v41 = vmul.f32 %v243_v33, %v208_v37 }
  0x9f   : > { %v306_v26 = vadd.f32 %v298_v11, %v248_v14  ;;  %v307_v27 = vadd.f32 %v299_v13, %v249_v15 }
  0xa0   : > { %v302_v46 = vadd.f32 %v294_v42, %v244_v40  ;;  %v303_v47 = vadd.f32 %v295_v43, %v245_v41 }
  0xa1   : > { %v312_v44 = vpop.permute.xlu1 %311  ;;  %v213_v45 = vpop.permute.xlu0 %212 }
  0xa2   : > { %v344_v48 = vmul.f32 %v339_v38, %v312_v44  ;;  %v345_v49 = vmul.f32 %v343_v39, %v312_v44  ;;  %v246_v54 = vmul.f32 %v239_v32, %v213_v45  ;;  %v247_v55 = vmul.f32 %v243_v33, %v213_v45 }
  0xa4   : > { %v352_v50 = vadd.f32 %v344_v48, %v302_v46  ;;  %v353_v51 = vadd.f32 %v345_v49, %v303_v47  ;;  %v304_v2 = vadd.f32 %v296_v62, %v246_v54  ;;  %v305_v3 = vadd.f32 %v297_v63, %v247_v55 }
  0xa5   : > { %v320_v56 = vpop.permute.xlu1 %319  ;;  %v367_v57 = vpop.permute.xlu0 %366 }
  0xa6   : > { %v384_v60 = vadd.f32 %v367_v57, %v352_v50  ;;  %v385_v61 = vadd.f32 %v367_v57, %v353_v51  ;;  %v348_v18 = vmul.f32 %v339_v38, %v320_v56  ;;  %v349_v19 = vmul.f32 %v343_v39, %v320_v56 }
  0xa7   : > { %v354_v21 = vadd.f32 %v346_v9, %v304_v2  ;;  %v355_v22 = vadd.f32 %v347_v10, %v305_v3 }
  0xa8   : > { %v392_v0 = vmax.f32 %v384_v60, 0.0  ;;  %v393_v1 = vmax.f32 %v385_v61, 0.0  ;;  %v356_v33 = vadd.f32 %v348_v18, %v306_v26  ;;  %v357_v34 = vadd.f32 %v349_v19, %v307_v27 }
  0xa9   : > { %v324_v4 = vpop.permute.xlu1 %323  ;;  %v382_v20 = vpop.permute.xlu0 %381 }
  0xaa   : > { %400 = vst [vmem:[%s780_s5] sm:$0xff] %v392_v0  ;;  %401 = vst [vmem:[%s780_s5 + $0x8] sm:$0xff] %v393_v1  ;;  %v350_v7 = vmul.f32 %v339_v38, %v324_v4  ;;  %v351_v8 = vmul.f32 %v343_v39, %v324_v4 }
  0xac   : > { %v358_v16 = vadd.f32 %v350_v7, %v308_v5  ;;  %v359_v17 = vadd.f32 %v351_v8, %v309_v6 }
  0xae   : > { %v390_v23 = vadd.f32 %v382_v20, %v358_v16  ;;  %v391_v24 = vadd.f32 %v382_v20, %v359_v17  ;;  %v372_v25 = vpop.permute.xlu1 %371 }
  0xaf   : > { %v386_v28 = vadd.f32 %v372_v25, %v354_v21  ;;  %v387_v12 = vadd.f32 %v372_v25, %v355_v22 }
  0xb0   : > { %v398_v29 = vmax.f32 %v390_v23, 0.0  ;;  %v399_v30 = vmax.f32 %v391_v24, 0.0 }
  0xb1   : > { %v394_v31 = vmax.f32 %v386_v28, 0.0  ;;  %v395_v32 = vmax.f32 %v387_v12, 0.0 }
  0xb2   : > { %406 = vst [vmem:[%s780_s5 + $0x30] sm:$0xff] %v398_v29  ;;  %407 = vst [vmem:[%s780_s5 + $0x38] sm:$0xff] %v399_v30  ;;  %v377_v35 = vpop.permute.xlu1 %376 }
  0xb3   : > { %402 = vst [vmem:[%s780_s5 + $0x10] sm:$0xff] %v394_v31  ;;  %403 = vst [vmem:[%s780_s5 + $0x18] sm:$0xff] %v395_v32  ;;  %v388_v36 = vadd.f32 %v377_v35, %v356_v33  ;;  %v389_v37 = vadd.f32 %v377_v35, %v357_v34 }
  0xb5   : > { %v396_v38 = vmax.f32 %v388_v36, 0.0  ;;  %v397_v39 = vmax.f32 %v389_v37, 0.0 }
  0xb7   : > { %404 = vst [vmem:[%s780_s5 + $0x20] sm:$0xff] %v396_v38  ;;  %405 = vst [vmem:[%s780_s5 + $0x28] sm:$0xff] %v397_v39 }
  0xb8   : > { %598 = shalt.err (!%p595_p5)
}
  0xb9   : > { %s599_s23 = scalar_lea.hbm %s795_s10, 1024  ;;  %s603_s28 = scalar_lea.hbm %s852_s3, 2048 }
  0xba   : > { %p600_p6 = scmp.ne.s32.totalorder %s795_s10, %s599_s23  ;;  %p604_p10 = scmp.lt.u32.totalorder %s795_s10, %s852_s3 }
  0xbb   : > { %p605_p11 = scmp.lt.u32.totalorder %s603_s28, %s599_s23  ;;  %p607_p13 = scmp.lt.u32.totalorder %s599_s23, %s795_s10 }
  0xbc   : > { %p601_p7 = pnand %p600_p6, %p731_p4 }
  0xbd   : > { %p606_p12 = por %p605_p11, %p604_p10 }
  0xbe   : > { %p602_p9 = pneg %p601_p7 }
  0xbf   : > { %p608_p0 = por %p607_p13, %p606_p12 }
  0xc1   : > { %p609_p1 = pnand %p608_p0, %p602_p9 }
  0xc3   : > { %612 = shalt.err (!%p609_p1)
}
  0xc4   : > { %s669_s4 = smov 256   ;;  %s670_s5 = smov 16  }
  0xc5   : > { %518 = dma.vmem_to_hbm [thread:$0]  (%p731_p4), %s797_s7, 1024, %s795_s10, %s803_s15, %s669_s4, %s669_s4, %s670_s5  }
  0xc6 PF: > { %p524_p2 = scmp.ge.s32.totalorder %s663_s17, 2  ;;  %s439_s6 = sand.u32 1, %s643_s12  }
  0xc7   : > { %s440_s8 = scalar_lea.sflag [#allocation3], %s439_s6 }
  0xc8   : > { %p521_p3 = pnand %p524_p2, %p738_p8 }
  0xca   : > { %638 = dma.done.wait (!%p521_p3), %s440_s8, 1024  }
  0xcb   : > { %640 = vsyncadd (!%p521_p3), %s440_s8, 4294966272  ;;  %s16_s17 = sadd.s32 1, %s663_s17   ;;  %s855_s12 = smov %s647_s13 }
  0xcc   : > { %p13_p5 = scmp.ge.s32.totalorder %s16_s17, 4   ;;  %s856_s13 = smov %s651_s14 }
  0xcd   : > { %s857_s14 = smov %s744_s25  ;;  %s858_s15 = smov %s659_s16 }
  0xce   : > { %s859_s16 = smov %s861_s20  ;;  %15 = sbr.rel (!%p13_p5) target bundleno = 4 (0x4), region = 67 }
  0xd5   :  { %445 = vsyncpa [#allocation3], 1 }
  0xd6   :  { %447 = vsyncpa [#allocation3 + $0x1], 1 }

</bundles_post_ra>
